<compile_context>
chip_gen: v7x
topology: tpu7x:2x2x1
jax: 0.10.0
libtpu: 0.0.40
codegen_flags: <defaults>
</compile_context>

<pallas_src>
import jax
import jax.numpy as jnp
from jax.experimental import pallas as pl
from jax.experimental.pallas import tpu as pltpu


def _mlp_kernel(x_ref, w1_ref, b1_ref, w2_ref, b2_ref, w3_ref, b3_ref, o_ref):
    x = x_ref[...]                                                     # (tb, F)
    h1 = jnp.dot(x, w1_ref[...], preferred_element_type=jnp.float32) + b1_ref[...]
    h1 = jnp.maximum(h1, 0.0)                                          # (tb, H)
    h2 = jnp.dot(h1, w2_ref[...], preferred_element_type=jnp.float32) + b2_ref[...]
    h2 = jnp.maximum(h2, 0.0)                                          # (tb, H)
    # Final Linear(H, 1): skip the N=1 MXU pass.  Transpose (XLU slot has slack),
    # multiply by the (H, 1) weight column on the VPU and reduce over sublanes;
    # the result is already a lane-dense (1, tb) row, stored unmasked.
    h2t = h2.T                                                         # (H, tb)
    out_row = jnp.sum(h2t * w3_ref[...], axis=0, keepdims=True)        # (1, tb)
    out_row = out_row + b3_ref[...]                                    # (1,1) bcast
    o_ref[...] = out_row.astype(o_ref.dtype)


def _round_up(x, m):
    return ((x + m - 1) // m) * m


def _pick_batch_tile(B, F, itemsize=4):
    """Rows per grid step: multiple of 128 (lane-dense output row / aligned
    transpose), target 1024, capped so 2 double-buffered x tiles stay within a
    conservative VMEM budget (v7x has only 64 MiB physical VMEM)."""
    vmem_budget = 16 * 1024 * 1024                      # bytes for 2 x-tile buffers
    cap = max(128, (vmem_budget // (2 * F * itemsize)) // 128 * 128)
    return min(1024, cap, _round_up(B, 128))


def regression_model_forward(x, params, *, batch_tile=None):
    """x: (B, F) float32. Returns (B, 1), matching the PyTorch module forward."""
    B, F = x.shape
    H = params["w1"].shape[1]

    tb = batch_tile or _pick_batch_tile(B, F)
    assert tb % 128 == 0, "batch tile must be a multiple of 128"
    Bp = _round_up(B, tb)
    if Bp != B:
        x = jnp.pad(x, ((0, Bp - B), (0, 0)))
    num_tiles = Bp // tb

    w1, b1 = params["w1"], params["b1"].reshape(1, H)
    w2, b2 = params["w2"], params["b2"].reshape(1, H)
    w3, b3 = params["w3"].reshape(H, 1), params["b3"].reshape(1, 1)

    out_rows = pl.pallas_call(
        _mlp_kernel,
        out_shape=jax.ShapeDtypeStruct((num_tiles, tb), x.dtype),
        grid_spec=pltpu.PrefetchScalarGridSpec(
            num_scalar_prefetch=0,
            grid=(num_tiles,),
            in_specs=[
                pl.BlockSpec((tb, F), lambda i: (i, 0)),   # x tile (streamed)
                pl.BlockSpec((F, H), lambda i: (0, 0)),    # w1 (resident)
                pl.BlockSpec((1, H), lambda i: (0, 0)),    # b1
                pl.BlockSpec((H, H), lambda i: (0, 0)),    # w2
                pl.BlockSpec((1, H), lambda i: (0, 0)),    # b2
                pl.BlockSpec((H, 1), lambda i: (0, 0)),    # w3 column
                pl.BlockSpec((1, 1), lambda i: (0, 0)),    # b3
            ],
            out_specs=pl.BlockSpec((1, tb), lambda i: (i, 0)),  # lane-dense row
        ),
        compiler_params=pltpu.CompilerParams(
            dimension_semantics=("parallel",),       # v7x: 2 TCs share the grid
            vmem_limit_bytes=32 * 1024 * 1024,
        ),
    )(x, w1, b1, w2, b2, w3, b3)

    return out_rows.reshape(Bp, 1)[:B]


def init_params(key, input_features, hidden=32):
    """Deterministic init mirroring nn.Linear default (uniform +/- 1/sqrt(fan_in))."""
    ks = jax.random.split(key, 6)

    def lin(kw, kb, fan_in, fan_out):
        bound = 1.0 / jnp.sqrt(fan_in)
        w = jax.random.uniform(kw, (fan_in, fan_out), jnp.float32, -bound, bound)
        b = jax.random.uniform(kb, (fan_out,), jnp.float32, -bound, bound)
        return w, b

    w1, b1 = lin(ks[0], ks[1], input_features, hidden)
    w2, b2 = lin(ks[2], ks[3], hidden, hidden)
    w3, b3 = lin(ks[4], ks[5], hidden, 1)
    return {"w1": w1, "b1": b1, "w2": w2, "b2": b2, "w3": w3, "b3": b3}


def _reference(x, p):
    h1 = jnp.maximum(x @ p["w1"] + p["b1"], 0.0)
    h2 = jnp.maximum(h1 @ p["w2"] + p["b2"], 0.0)
    return h2 @ p["w3"] + p["b3"]


if __name__ == "__main__":
    key = jax.random.PRNGKey(0)
    k_x1, k_x2, k_p = jax.random.split(key, 3)

    F = 16                                   # input_features
    params = init_params(k_p, F)

    # Small, non-tile-aligned batch: exercises the zero-pad + trim path.
    x_small = jax.random.normal(k_x1, (8, F), jnp.float32)
    out_small = jax.block_until_ready(regression_model_forward(x_small, params))
    assert out_small.shape == (8, 1)
    assert jnp.allclose(out_small, _reference(x_small, params), atol=1e-5, rtol=1e-5)

    # Larger batch: tb=1024 -> grid of 2 parallel steps (DMA/compute overlap,
    # even split across v7x's two TensorCores).
    x_big = jax.random.normal(k_x2, (2048, F), jnp.float32)
    out_big = jax.block_until_ready(regression_model_forward(x_big, params))
    assert out_big.shape == (2048, 1)
    assert jnp.allclose(out_big, _reference(x_big, params), atol=1e-5, rtol=1e-5)

    print("KERNEL_OK")
</pallas_src>

<mosaic_0001>
module attributes {stable_mosaic.version = 11 : i64} {
  func.func @_mlp_kernel(%arg0: i32, %arg1: memref<128x16xf32, #tpu.memory_space<vmem>>, %arg2: memref<16x32xf32, #tpu.memory_space<vmem>>, %arg3: memref<1x32xf32, #tpu.memory_space<vmem>>, %arg4: memref<32x32xf32, #tpu.memory_space<vmem>>, %arg5: memref<1x32xf32, #tpu.memory_space<vmem>>, %arg6: memref<32x1xf32, #tpu.memory_space<vmem>>, %arg7: memref<1x1xf32, #tpu.memory_space<vmem>>, %arg8: memref<1x128xf32, #tpu.memory_space<vmem>>) attributes {dimension_semantics = [#tpu.dimension_semantics<parallel>], iteration_bounds = array<i64: 1>, scalar_prefetch = 0 : i64, scratch_operands = 0 : i64, tpu.core_type = #tpu.core_type<tc>, window_params = [{transform_indices = @transform_0, window_bounds = array<i64: 128, 16>}, {pipeline_mode = #tpu.pipeline_mode<synchronous>, transform_indices = @transform_1, window_bounds = array<i64: 16, 32>}, {pipeline_mode = #tpu.pipeline_mode<synchronous>, transform_indices = @transform_2, window_bounds = array<i64: 1, 32>}, {pipeline_mode = #tpu.pipeline_mode<synchronous>, transform_indices = @transform_3, window_bounds = array<i64: 32, 32>}, {pipeline_mode = #tpu.pipeline_mode<synchronous>, transform_indices = @transform_4, window_bounds = array<i64: 1, 32>}, {pipeline_mode = #tpu.pipeline_mode<synchronous>, transform_indices = @transform_5, window_bounds = array<i64: 32, 1>}, {pipeline_mode = #tpu.pipeline_mode<synchronous>, transform_indices = @transform_6, window_bounds = array<i64: 1, 1>}, {transform_indices = @transform_7, window_bounds = array<i64: 1, 128>}]} {
    %c0 = arith.constant 0 : index
    %c0_0 = arith.constant 0 : index
    %0 = vector.load %arg1[%c0, %c0_0] : memref<128x16xf32, #tpu.memory_space<vmem>>, vector<128x16xf32>
    %c0_1 = arith.constant 0 : index
    %c0_2 = arith.constant 0 : index
    %1 = vector.load %arg2[%c0_1, %c0_2] : memref<16x32xf32, #tpu.memory_space<vmem>>, vector<16x32xf32>
    %cst = arith.constant dense<0.000000e+00> : vector<128x32xf32>
    %2 = tpu.matmul %0, %1, %cst {dimension_numbers = #tpu.dot_dimension_numbers<[1], [0], [0], [1], [0, 0, 1, 1], [], []>} : vector<128x16xf32>, vector<16x32xf32>, vector<128x32xf32> -> vector<128x32xf32>
    %c0_3 = arith.constant 0 : index
    %c0_4 = arith.constant 0 : index
    %3 = vector.load %arg3[%c0_3, %c0_4] : memref<1x32xf32, #tpu.memory_space<vmem>>, vector<1x32xf32>
    %4 = vector.broadcast %3 : vector<1x32xf32> to vector<128x32xf32>
    %5 = arith.addf %2, %4 : vector<128x32xf32>
    %cst_5 = arith.constant 0.000000e+00 : f32
    %6 = vector.broadcast %cst_5 : f32 to vector<128x32xf32>
    %7 = arith.maximumf %5, %6 : vector<128x32xf32>
    %c0_6 = arith.constant 0 : index
    %c0_7 = arith.constant 0 : index
    %8 = vector.load %arg4[%c0_6, %c0_7] : memref<32x32xf32, #tpu.memory_space<vmem>>, vector<32x32xf32>
    %cst_8 = arith.constant dense<0.000000e+00> : vector<128x32xf32>
    %9 = tpu.matmul %7, %8, %cst_8 {dimension_numbers = #tpu.dot_dimension_numbers<[1], [0], [0], [1], [0, 0, 1, 1], [], []>} : vector<128x32xf32>, vector<32x32xf32>, vector<128x32xf32> -> vector<128x32xf32>
    %c0_9 = arith.constant 0 : index
    %c0_10 = arith.constant 0 : index
    %10 = vector.load %arg5[%c0_9, %c0_10] : memref<1x32xf32, #tpu.memory_space<vmem>>, vector<1x32xf32>
    %11 = vector.broadcast %10 : vector<1x32xf32> to vector<128x32xf32>
    %12 = arith.addf %9, %11 : vector<128x32xf32>
    %cst_11 = arith.constant 0.000000e+00 : f32
    %13 = vector.broadcast %cst_11 : f32 to vector<128x32xf32>
    %14 = arith.maximumf %12, %13 : vector<128x32xf32>
    %15 = tpu.transpose %14, [1, 0] : vector<128x32xf32> -> vector<32x128xf32>
    %c0_12 = arith.constant 0 : index
    %c0_13 = arith.constant 0 : index
    %16 = vector.load %arg6[%c0_12, %c0_13] : memref<32x1xf32, #tpu.memory_space<vmem>>, vector<32x1xf32>
    %17 = vector.broadcast %16 : vector<32x1xf32> to vector<32x128xf32>
    %18 = arith.mulf %15, %17 : vector<32x128xf32>
    %cst_14 = arith.constant dense<0.000000e+00> : vector<128xf32>
    %19 = vector.multi_reduction <add>, %18, %cst_14 [0] : vector<32x128xf32> to vector<128xf32>
    %20 = vector.shape_cast %19 : vector<128xf32> to vector<1x128xf32>
    %c0_15 = arith.constant 0 : index
    %c0_16 = arith.constant 0 : index
    %21 = vector.load %arg7[%c0_15, %c0_16] : memref<1x1xf32, #tpu.memory_space<vmem>>, vector<1x1xf32>
    %22 = vector.broadcast %21 : vector<1x1xf32> to vector<1x128xf32>
    %23 = arith.addf %20, %22 : vector<1x128xf32>
    %c0_17 = arith.constant 0 : index
    %c0_18 = arith.constant 0 : index
    %24 = vector.load %arg8[%c0_17, %c0_18] : memref<1x128xf32, #tpu.memory_space<vmem>>, vector<1x128xf32>
    tpu.vector_store %arg8[%c0_17, %c0_18], %23 {strides = array<i32>} : memref<1x128xf32, #tpu.memory_space<vmem>>, vector<1x128xf32>,
    return
  }
  func.func @transform_0(%arg0: i32) -> (i32, i32) {
    %c0_i32 = arith.constant 0 : i32
    %c0_i32_0 = arith.constant 0 : i32
    return %arg0, %c0_i32 : i32, i32
  }
  func.func @transform_1(%arg0: i32) -> (i32, i32) {
    %c0_i32 = arith.constant 0 : i32
    %c0_i32_0 = arith.constant 0 : i32
    %c0_i32_1 = arith.constant 0 : i32
    return %c0_i32, %c0_i32_0 : i32, i32
  }
  func.func @transform_2(%arg0: i32) -> (i32, i32) {
    %c0_i32 = arith.constant 0 : i32
    %c0_i32_0 = arith.constant 0 : i32
    %c0_i32_1 = arith.constant 0 : i32
    return %c0_i32, %c0_i32_0 : i32, i32
  }
  func.func @transform_3(%arg0: i32) -> (i32, i32) {
    %c0_i32 = arith.constant 0 : i32
    %c0_i32_0 = arith.constant 0 : i32
    %c0_i32_1 = arith.constant 0 : i32
    return %c0_i32, %c0_i32_0 : i32, i32
  }
  func.func @transform_4(%arg0: i32) -> (i32, i32) {
    %c0_i32 = arith.constant 0 : i32
    %c0_i32_0 = arith.constant 0 : i32
    %c0_i32_1 = arith.constant 0 : i32
    return %c0_i32, %c0_i32_0 : i32, i32
  }
  func.func @transform_5(%arg0: i32) -> (i32, i32) {
    %c0_i32 = arith.constant 0 : i32
    %c0_i32_0 = arith.constant 0 : i32
    %c0_i32_1 = arith.constant 0 : i32
    return %c0_i32, %c0_i32_0 : i32, i32
  }
  func.func @transform_6(%arg0: i32) -> (i32, i32) {
    %c0_i32 = arith.constant 0 : i32
    %c0_i32_0 = arith.constant 0 : i32
    %c0_i32_1 = arith.constant 0 : i32
    return %c0_i32, %c0_i32_0 : i32, i32
  }
  func.func @transform_7(%arg0: i32) -> (i32, i32) {
    %c0_i32 = arith.constant 0 : i32
    %c0_i32_0 = arith.constant 0 : i32
    return %arg0, %c0_i32 : i32, i32
  }
}

</mosaic_0001>

<bundles_post_ra>
// kernel: tpu_custom_call.1
= control target key start
LH: loop header
LB: loop body
LE: loop exit
PB: predicated region body
PF: predicated region fallthrough
CT: control target
= control target key end

     0   :  { %s925_s0 = inlined_call_operand.vmem [shape: f32[128,16], index: 0, kind: input, shape index: {}]   ;;  %s926_s1 = inlined_call_operand.vmem [shape: f32[16,32], index: 1, kind: input, shape index: {}]   ;;  %s927_s2 = inlined_call_operand.vmem [shape: f32[1,32], index: 2, kind: input, shape index: {}]   ;;  %s928_s3 = inlined_call_operand.vmem [shape: f32[32,32], index: 3, kind: input, shape index: {}]   ;;  %s929_s4 = inlined_call_operand.vmem [shape: f32[1,32], index: 4, kind: input, shape index: {}]   ;;  %s930_s5 = inlined_call_operand.vmem [shape: f32[32,1], index: 5, kind: input, shape index: {}]   ;;  %s931_s6 = inlined_call_operand.<no memory space> [shape: f32[1,1], index: 6, kind: input, shape index: {}]   ;;  %s932_s7 = inlined_call_operand.hbm [shape: f32[1,128], index: 7, kind: output, shape index: {}]  }
   0x1   :  { %v12_v0 = vstv %s931_s6 }
   0x2   :  { %13 = vst [vmem:[#allocation2] sm:$0x1] %v12_v0 }
   0x3   :  { %v45_v1 = vld [vmem:[%s926_s1] sm:$0xff]  ;;  %v46_v2 = vld [vmem:[%s926_s1 + $0x8] sm:$0xff]  ;;  %vm54_vm0 = vcmask 130048   ;;  %v31_v6 = vld [vmem:[%s925_s0 + $0x10] sm:$0xff] }
   0x4   :  { %v29_v3 = vld [vmem:[%s925_s0] sm:$0xff]  ;;  %v712_v4 = vpack.c.bf16 %v46_v2, %v45_v1  ;;  %v30_v5 = vld [vmem:[%s925_s0 + $0x8] sm:$0xff] }
   0x5   :  { %656 = vmatprep.mubr.msk.f32.mxu0 %vm54_vm0, %v29_v3  ;;  %v264_v7 = vld [vmem:[%s928_s3] sm:$0xff]  ;;  %v265_v8 = vld [vmem:[%s928_s3 + $0x8] sm:$0xff] }
   0x6   :  { %713 = vmatprep.subr.bf16.mxu0 %v712_v4 }
   0x7   :  { %715 = vmatpush3.bf16.msra.mxu0 %v712_v4 }
   0x8   :  { %14 = vsyncpa [#allocation4], 0  ;;  %v716_v9 = vpack.c.bf16 %v265_v8, %v264_v7  ;;  %v32_v10 = vld [vmem:[%s925_s0 + $0x18] sm:$0xff]  ;;  %v33_v11 = vld [vmem:[%s925_s0 + $0x20] sm:$0xff]  ;;  %v752_v27 = vmov 0   ;;  %vm275_vm1 = vcmask 261120  }
   0x9   :  { %v34_v12 = vld [vmem:[%s925_s0 + $0x28] sm:$0xff]  ;;  %v35_v13 = vld [vmem:[%s925_s0 + $0x30] sm:$0xff]  ;;  %v36_v14 = vld [vmem:[%s925_s0 + $0x38] sm:$0xff]  ;;  %727 = vset.pattern.permute.xlu1 %v752_v27  ;;  %726 = vset.pattern.permute.xlu0 %v752_v27 }
   0xa   :  { %657 = vmatmul.mubr.msk.f32.vlgmr.msra.gmra.mrb[0].mxu0 %vm54_vm0, %v30_v5  ;;  %717 = vmatprep.subr.bf16.mxu1 %v716_v9  ;;  %v37_v15 = vld [vmem:[%s925_s0 + $0x40] sm:$0xff]  ;;  %v38_v16 = vld [vmem:[%s925_s0 + $0x48] sm:$0xff]  ;;  %v39_v17 = vld [vmem:[%s925_s0 + $0x50] sm:$0xff] }
   0xb   :  { %659 = vmatprep.mubr.msk.f32.mxu0 %vm54_vm0, %v31_v6  ;;  %719 = vmatpush3.bf16.msra.mxu1 %v716_v9  ;;  %v40_v18 = vld [vmem:[%s925_s0 + $0x58] sm:$0xff]  ;;  %v41_v19 = vld [vmem:[%s925_s0 + $0x60] sm:$0xff]  ;;  %v42_v20 = vld [vmem:[%s925_s0 + $0x68] sm:$0xff] }
   0xc   :  { %v43_v21 = vld [vmem:[%s925_s0 + $0x70] sm:$0xff]  ;;  %v44_v22 = vld [vmem:[%s925_s0 + $0x78] sm:$0xff]  ;;  %v580_v29 = vld [vmem:[%s927_s2] ss:$0 sm:$0xff] }
   0xd   :  { %v266_v23 = vld [vmem:[%s928_s3 + $0x10] sm:$0xff]  ;;  %v267_v24 = vld [vmem:[%s928_s3 + $0x18] sm:$0xff] }
   0xe   :  { %660 = vmatmul.mubr.msk.f32.gmra.mrb[2].mxu0 %vm54_vm0, %v32_v10  ;;  %v720_v25 = vpack.c.bf16 %v267_v24, %v266_v23  ;;  %v519_v26 = vld [vmem:[%s930_s5 + $0x10] sm:$0xff]  ;;  %v520_v28 = vld [vmem:[%s930_s5 + $0x18] sm:$0xff] }
   0xf   :  { %662 = vmatprep.mubr.msk.f32.mxu0 %vm54_vm0, %v33_v11  ;;  %533 = vperm.xlu1 %727, %v519_v26  }
  0x10   :  { %721 = vmatprep.subr.bf16.mxu1 %v720_v25 }
  0x11   :  { %723 = vmatpush3.bf16.msra.mxu1 %v720_v25 }
  0x12   :  { %663 = vmatmul.mubr.msk.f32.gmra.mrb[4].mxu0 %vm54_vm0, %v34_v12 }
  0x13   :  { %665 = vmatprep.mubr.msk.f32.mxu0 %vm54_vm0, %v35_v13  ;;  %538 = vperm.xlu1 %727, %v520_v28  }
  0x16   :  { %666 = vmatmul.mubr.msk.f32.gmra.mrb[6].mxu0 %vm54_vm0, %v36_v14  ;;  %v517_v14 = vld [vmem:[%s930_s5] sm:$0xff] }
  0x17   :  { %668 = vmatprep.mubr.msk.f32.mxu0 %vm54_vm0, %v37_v15  ;;  %523 = vperm.xlu0 %726, %v517_v14   ;;  %v518_v15 = vld [vmem:[%s930_s5 + $0x8] sm:$0xff] }
  0x1a   :  { %669 = vmatmul.mubr.msk.f32.gmra.mrb[8].mxu0 %vm54_vm0, %v38_v16  ;;  %v554_v16 = vld [vmem:[#allocation2] sm:$0x1] }
  0x1b   :  { %671 = vmatprep.mubr.msk.f32.mxu0 %vm54_vm0, %v39_v17  ;;  %528 = vperm.xlu0 %726, %v518_v15   ;;  %v597_v17 = vld [vmem:[%s929_s4] ss:$0 sm:$0xff]  ;;  %s753_s4 = smov [#allocation3]  }
  0x1c   :  { %s572_s5 = sshll.u32 %s753_s4, 4  ;;  %s573_s5 = int_to_ptr.vmem [resolvable:$true] %s572_s5 }
  0x1d   :  { %s728_s29 = scalar_lea.vmem %s573_s5, 16  ;;  %s732_s30 = scalar_lea.vmem %s573_s5, 32 }
  0x1e   :  { %672 = vmatmul.mubr.msk.f32.gmra.mrb[10].mxu0 %vm54_vm0, %v40_v18  ;;  %p729_p0 = scmp.ne.s32.totalorder %s573_s5, %s728_s29  ;;  %p733_p1 = scmp.lt.s32.totalorder %s573_s5, %s573_s5 }
  0x1f   :  { %674 = vmatprep.mubr.msk.f32.mxu0 %vm54_vm0, %v41_v19  ;;  %557 = vperm.xlu0 %726, %v554_v16   ;;  %v560_v16 = vlaneseq  ;;  %p734_p2 = scmp.lt.s32.totalorder %s732_s30, %s728_s29 }
  0x21   :  { %p735_p3 = por %p734_p2, %p733_p1 }
  0x22   :  { %675 = vmatmul.mubr.msk.f32.gmra.mrb[12].mxu0 %vm54_vm0, %v42_v20 }
  0x23   :  { %677 = vmatprep.mubr.msk.f32.mxu0 %vm54_vm0, %v43_v21  ;;  %p736_p4 = pnand %p735_p3, %p729_p0 }
  0x26   :  { %678 = vmatmul.mubr.msk.f32.gmra.mrb[14].mxu0 %vm54_vm0, %v44_v22 }
  0xdd   :  { %v658_v30 = vpop.f32.mrb[0].mxu0 }
  0xde   :  { %v175_v31 = vadd.f32 %v658_v30, %v580_v29  ;;  %v169_v32 = vpop.f32.mrb[1].mxu0 }
  0xdf   :  { %v170_v33 = vadd.f32 %v580_v29, %v169_v32 }
  0xe0   :  { %v249_v36 = vmax.f32 %v175_v31, 0.0 }
  0xe1   :  { %v248_v34 = vmax.f32 %v170_v33, 0.0  ;;  %v661_v35 = vpop.f32.mrb[2].mxu0 }
  0xe2   :  { %v185_v37 = vadd.f32 %v661_v35, %v580_v29  ;;  %v179_v38 = vpop.f32.mrb[3].mxu0 }
  0xe3   :  { %v180_v39 = vadd.f32 %v580_v29, %v179_v38  ;;  %688 = vmatprep.mubr.msk.f32.mxu1 %vm275_vm1, %v248_v34 }
  0xe4   :  { %v251_v40 = vmax.f32 %v185_v37, 0.0  ;;  %689 = vmatmul.mubr.msk.f32.vlgmr.msra.gmra.mrb[0].mxu1 %vm275_vm1, %v249_v36 }
  0xe5   :  { %v250_v41 = vmax.f32 %v180_v39, 0.0  ;;  %v664_v42 = vpop.f32.mrb[4].mxu0 }
  0xe6   :  { %v195_v43 = vadd.f32 %v664_v42, %v580_v29  ;;  %v189_v44 = vpop.f32.mrb[5].mxu0 }
  0xe7   :  { %691 = vmatprep.mubr.msk.f32.mxu1 %vm275_vm1, %v250_v41  ;;  %v190_v45 = vadd.f32 %v580_v29, %v189_v44 }
  0xe8   :  { %692 = vmatmul.mubr.msk.f32.gmra.mrb[2].mxu1 %vm275_vm1, %v251_v40  ;;  %v253_v46 = vmax.f32 %v195_v43, 0.0 }
  0xe9   :  { %v252_v47 = vmax.f32 %v190_v45, 0.0  ;;  %v667_v48 = vpop.f32.mrb[6].mxu0 }
  0xea   :  { %v205_v49 = vadd.f32 %v667_v48, %v580_v29  ;;  %v199_v50 = vpop.f32.mrb[7].mxu0 }
  0xeb   :  { %694 = vmatprep.mubr.msk.f32.mxu1 %vm275_vm1, %v252_v47  ;;  %v200_v51 = vadd.f32 %v580_v29, %v199_v50 }
  0xec   :  { %695 = vmatmul.mubr.msk.f32.gmra.mrb[4].mxu1 %vm275_vm1, %v253_v46  ;;  %v255_v52 = vmax.f32 %v205_v49, 0.0 }
  0xed   :  { %v254_v53 = vmax.f32 %v200_v51, 0.0  ;;  %v670_v54 = vpop.f32.mrb[8].mxu0 }
  0xee   :  { %v215_v55 = vadd.f32 %v670_v54, %v580_v29  ;;  %v209_v56 = vpop.f32.mrb[9].mxu0 }
  0xef   :  { %697 = vmatprep.mubr.msk.f32.mxu1 %vm275_vm1, %v254_v53  ;;  %v210_v57 = vadd.f32 %v580_v29, %v209_v56 }
  0xf0   :  { %698 = vmatmul.mubr.msk.f32.gmra.mrb[6].mxu1 %vm275_vm1, %v255_v52  ;;  %v257_v58 = vmax.f32 %v215_v55, 0.0 }
  0xf1   :  { %v256_v59 = vmax.f32 %v210_v57, 0.0  ;;  %v673_v60 = vpop.f32.mrb[10].mxu0 }
  0xf2   :  { %v225_v61 = vadd.f32 %v673_v60, %v580_v29  ;;  %v219_v62 = vpop.f32.mrb[11].mxu0 }
  0xf3   :  { %700 = vmatprep.mubr.msk.f32.mxu1 %vm275_vm1, %v256_v59  ;;  %v220_v63 = vadd.f32 %v580_v29, %v219_v62 }
  0xf4   :  { %701 = vmatmul.mubr.msk.f32.gmra.mrb[8].mxu1 %vm275_vm1, %v257_v58  ;;  %v259_v0 = vmax.f32 %v225_v61, 0.0 }
  0xf5   :  { %v258_v1 = vmax.f32 %v220_v63, 0.0  ;;  %v676_v2 = vpop.f32.mrb[12].mxu0 }
  0xf6   :  { %v235_v3 = vadd.f32 %v676_v2, %v580_v29  ;;  %v229_v4 = vpop.f32.mrb[13].mxu0  ;;  %v534_v2 = vpop.permute.xlu1 %533 }
  0xf7   :  { %703 = vmatprep.mubr.msk.f32.mxu1 %vm275_vm1, %v258_v1  ;;  %v230_v5 = vadd.f32 %v580_v29, %v229_v4  ;;  %v524_v4 = vpop.permute.xlu0 %523 }
  0xf8   :  { %704 = vmatmul.mubr.msk.f32.gmra.mrb[10].mxu1 %vm275_vm1, %v259_v0  ;;  %v261_v6 = vmax.f32 %v235_v3, 0.0 }
  0xf9   :  { %v260_v7 = vmax.f32 %v230_v5, 0.0  ;;  %v679_v8 = vpop.f32.mrb[14].mxu0 }
  0xfa   :  { %v245_v9 = vadd.f32 %v679_v8, %v580_v29  ;;  %v239_v10 = vpop.f32.mrb[15].mxu0  ;;  %v539_v3 = vpop.permute.xlu1 %538 }
  0xfb   :  { %706 = vmatprep.mubr.msk.f32.mxu1 %vm275_vm1, %v260_v7  ;;  %v240_v11 = vadd.f32 %v580_v29, %v239_v10  ;;  %v529_v7 = vpop.permute.xlu0 %528 }
  0xfc   :  { %707 = vmatmul.mubr.msk.f32.gmra.mrb[12].mxu1 %vm275_vm1, %v261_v6  ;;  %v263_v12 = vmax.f32 %v245_v9, 0.0 }
  0xfd   :  { %v262_v13 = vmax.f32 %v240_v11, 0.0 }
  0xff   :  { %709 = vmatprep.mubr.msk.f32.mxu1 %vm275_vm1, %v262_v13 }
 0x100   :  { %710 = vmatmul.mubr.msk.f32.gmra.mrb[14].mxu1 %vm275_vm1, %v263_v12 }
 0x1b7   :  { %v690_v18 = vpop.f32.mrb[0].mxu1 }
 0x1b8   :  { %v390_v19 = vpop.f32.mrb[1].mxu1  ;;  %v396_v21 = vadd.f32 %v690_v18, %v597_v17 }
 0x1b9   :  { %v391_v20 = vadd.f32 %v597_v17, %v390_v19  ;;  %v561_v19 = vshrl.u32 %v560_v16, 7 }
 0x1ba   :  { %v470_v25 = vmax.f32 %v396_v21, 0.0 }
 0x1bb   :  { %v469_v22 = vmax.f32 %v391_v20, 0.0  ;;  %v693_v23 = vpop.f32.mrb[2].mxu1 }
 0x1bc   :  { %v400_v24 = vpop.f32.mrb[3].mxu1  ;;  %v406_v29 = vadd.f32 %v693_v23, %v597_v17 }
 0x1bd   :  { %485 = vxpose.xlu1.b32.start [1/16] (narrow) %v469_v22, 32  ;;  %v401_v26 = vadd.f32 %v597_v17, %v400_v24  ;;  %v562_v22 = vsub.s32 0, %v561_v19  ;;  %v558_v24 = vpop.permute.xlu0 %557 }
 0x1be   :  { %v472_v33 = vmax.f32 %v406_v29, 0.0 }
 0x1bf   :  { %v696_v27 = vpop.f32.mrb[4].mxu1  ;;  %v471_v30 = vmax.f32 %v401_v26, 0.0  ;;  %v563_v26 = vrot.slane %v558_v24, %v562_v22 }
 0x1c0   :  { %v410_v28 = vpop.f32.mrb[5].mxu1  ;;  %v416_v37 = vadd.f32 %v696_v27, %v597_v17 }
 0x1c1   :  { %486 = vxpose.xlu1.b32.cont [2/16] (narrow) %v470_v25, 32  ;;  %v411_v34 = vadd.f32 %v597_v17, %v410_v28 }
 0x1c2   :  { %v474_v41 = vmax.f32 %v416_v37, 0.0 }
 0x1c3   :  { %v699_v31 = vpop.f32.mrb[6].mxu1  ;;  %v473_v38 = vmax.f32 %v411_v34, 0.0 }
 0x1c4   :  { %v420_v32 = vpop.f32.mrb[7].mxu1  ;;  %v426_v45 = vadd.f32 %v699_v31, %v597_v17 }
 0x1c5   :  { %487 = vxpose.xlu1.b32.cont [3/16] (narrow) %v471_v30, 32  ;;  %v421_v42 = vadd.f32 %v597_v17, %v420_v32 }
 0x1c6   :  { %v476_v49 = vmax.f32 %v426_v45, 0.0 }
 0x1c7   :  { %v702_v35 = vpop.f32.mrb[8].mxu1  ;;  %v475_v46 = vmax.f32 %v421_v42, 0.0 }
 0x1c8   :  { %v430_v36 = vpop.f32.mrb[9].mxu1  ;;  %v436_v51 = vadd.f32 %v702_v35, %v597_v17 }
 0x1c9   :  { %488 = vxpose.xlu1.b32.cont [4/16] (narrow) %v472_v33, 32  ;;  %v431_v50 = vadd.f32 %v597_v17, %v430_v36 }
 0x1ca   :  { %v478_v53 = vmax.f32 %v436_v51, 0.0 }
 0x1cb   :  { %v705_v39 = vpop.f32.mrb[10].mxu1  ;;  %v477_v52 = vmax.f32 %v431_v50, 0.0 }
 0x1cc   :  { %v440_v40 = vpop.f32.mrb[11].mxu1  ;;  %v446_v55 = vadd.f32 %v705_v39, %v597_v17 }
 0x1cd   :  { %489 = vxpose.xlu1.b32.cont [5/16] (narrow) %v473_v38, 32  ;;  %v441_v54 = vadd.f32 %v597_v17, %v440_v40 }
 0x1ce   :  { %v480_v57 = vmax.f32 %v446_v55, 0.0 }
 0x1cf   :  { %v708_v43 = vpop.f32.mrb[12].mxu1  ;;  %v479_v56 = vmax.f32 %v441_v54, 0.0 }
 0x1d0   :  { %v450_v44 = vpop.f32.mrb[13].mxu1  ;;  %v456_v59 = vadd.f32 %v708_v43, %v597_v17 }
 0x1d1   :  { %490 = vxpose.xlu1.b32.cont [6/16] (narrow) %v474_v41, 32  ;;  %v451_v58 = vadd.f32 %v597_v17, %v450_v44 }
 0x1d2   :  { %v482_v61 = vmax.f32 %v456_v59, 0.0 }
 0x1d3   :  { %v711_v47 = vpop.f32.mrb[14].mxu1  ;;  %v481_v60 = vmax.f32 %v451_v58, 0.0 }
 0x1d4   :  { %v460_v48 = vpop.f32.mrb[15].mxu1  ;;  %v466_v63 = vadd.f32 %v711_v47, %v597_v17 }
 0x1d5   :  { %491 = vxpose.xlu1.b32.cont [7/16] (narrow) %v475_v46, 32  ;;  %v461_v62 = vadd.f32 %v597_v17, %v460_v48 }
 0x1d6   :  { %v484_v1 = vmax.f32 %v466_v63, 0.0 }
 0x1d7   :  { %v483_v0 = vmax.f32 %v461_v62, 0.0 }
 0x1d9   :  { %492 = vxpose.xlu1.b32.cont [8/16] (narrow) %v476_v49, 32 }
 0x1dd   :  { %493 = vxpose.xlu1.b32.cont [9/16] (narrow) %v477_v52, 32 }
 0x1e1   :  { %494 = vxpose.xlu1.b32.cont [10/16] (narrow) %v478_v53, 32 }
 0x1e5   :  { %495 = vxpose.xlu1.b32.cont [11/16] (narrow) %v479_v56, 32 }
 0x1e9   :  { %496 = vxpose.xlu1.b32.cont [12/16] (narrow) %v480_v57, 32 }
 0x1ed   :  { %497 = vxpose.xlu1.b32.cont [13/16] (narrow) %v481_v60, 32 }
 0x1f1   :  { %498 = vxpose.xlu1.b32.cont [14/16] (narrow) %v482_v61, 32 }
 0x1f5   :  { %499 = vxpose.xlu1.b32.cont [15/16] (narrow) %v483_v0, 32 }
 0x1f9   :  { %500 = vxpose.xlu1.b32.end [16/16] (narrow) %v484_v1, 32 }
 0x23d   :  { %v501_v5 = vpop.trf.xlu1 }
 0x23e   :  { %v541_v10 = vmul.f32 %v524_v4, %v501_v5 }
 0x241   :  { %v502_v6 = vpop.trf.xlu1 }
 0x242   :  { %v542_v8 = vmul.f32 %v529_v7, %v502_v6 }
 0x244   :  { %v545_v12 = vadd.f32 %v542_v8, %v541_v10 }
 0x245   :  { %v503_v9 = vpop.trf.xlu1 }
 0x246   :  { %v543_v11 = vmul.f32 %v534_v2, %v503_v9 }
 0x248   :  { %v546_v14 = vadd.f32 %v545_v12, %v543_v11 }
 0x249   :  { %v504_v13 = vpop.trf.xlu1 }
 0x24a   :  { %v544_v15 = vmul.f32 %v539_v3, %v504_v13 }
 0x24c   :  { %v547_v17 = vadd.f32 %v546_v14, %v544_v15 }
 0x24e   :  { %v548_v18 = vrot.slane %v547_v17, 4 }
 0x250   :  { %v549_v20 = vadd.f32 %v548_v18, %v547_v17 }
 0x252   :  { %v550_v21 = vrot.slane %v549_v20, 2 }
 0x254   :  { %v551_v23 = vadd.f32 %v550_v21, %v549_v20 }
 0x256   :  { %v552_v25 = vrot.slane %v551_v23, 1 }
 0x258   :  { %v553_v27 = vadd.f32 %v552_v25, %v551_v23 }
 0x25a   :  { %v564_v28 = vadd.f32 %v563_v26, %v553_v27 }
 0x25c   :  { %565 = vst [vmem:[#allocation3] sm:$0x1] %v564_v28 }
 0x25d   :  { %739 = shalt.err (!%p736_p4)
}
 0x25e   :  { %s740_s9 = scalar_lea.hbm %s932_s7, 16 }
 0x25f   :  { %p741_p5 = scmp.ne.s32.totalorder %s932_s7, %s740_s9  ;;  %p744_p6 = scmp.lt.u32.totalorder %s740_s9, %s932_s7 }
 0x261   :  { %p746_p7 = pnand %p744_p6, %p741_p5 }
 0x263   :  { %749 = shalt.err (!%p746_p7)
}
 0x264   :  { %575 = dma.vmem_to_hbm [thread:$0]  %s573_s5, 16, %s932_s7, [#allocation4]  }
 0x265   :  { %750 = dma.done.wait [#allocation4], 16  }
 0x266   :  { %751 = vsyncadd [#allocation4], 4294967280 }
 0x267   :  { %579 = vsyncpa [#allocation4], 1 }

</bundles_post_ra>
